<compile_context>
chip_gen: v7x
topology: tpu7x:2x2x1
jax: 0.10.0
libtpu: 0.0.40
codegen_flags: <defaults>
</compile_context>

<pallas_src>
import functools

import jax
import jax.numpy as jnp
from jax import lax
from jax.experimental import pallas as pl
from jax.experimental.pallas import tpu as pltpu


def _round_up(x, m):
    return (x + m - 1) // m * m


# ---------------------------------------------------------------------------
# Fused impl: pad indices -> pallas_call (gather + histogram) -> crop + count add.
# All shape/config decisions are static under jit.
# ---------------------------------------------------------------------------
@functools.partial(
    jax.jit,
    static_argnames=("out_dim", "tm_max", "max_partials",
                     "single_buffer_resident", "high_precision"),
)
def _fused_lookup_and_count_impl(table_padded, counts_padded, indices, *,
                                 out_dim, tm_max, max_partials,
                                 single_buffer_resident, high_precision):
    e_pad, d_pad = table_padded.shape
    n = int(indices.size)
    flat = indices.reshape(-1).astype(jnp.int32)

    # Token tile: multiple of 8 sublanes, capped at tm_max per grid step.
    tm = min(tm_max, _round_up(max(n, 1), 8))
    n_blocks = -(-max(n, 1) // tm)
    # Leading "parallel" axis over token super-blocks (both TCs on v7x megacore);
    # inner "arbitrary" axis carries the per-partial counts accumulator.
    num_partials = max(1, min(max_partials, n_blocks))
    t_steps = -(-n_blocks // num_partials)
    n_pad = num_partials * t_steps * tm

    # Pad with -1: matches no embedding id -> zero output row, zero count.
    idx_pad = (jnp.full((n_pad,), -1, dtype=jnp.int32)
               .at[:n].set(flat).reshape(n_pad, 1))

    table_spec_kwargs = {}
    if single_buffer_resident:
        # Block index never changes -> no need for a second VMEM copy.
        table_spec_kwargs["pipeline_mode"] = pl.Buffered(1)

    precision = lax.Precision.HIGH if high_precision else lax.Precision.HIGHEST

    # Explicit VMEM budget: resident table (+1 copy unless single-buffered),
    # idx/out double buffers, one-hot/match temporaries, count partials.
    table_bytes = e_pad * d_pad * table_padded.dtype.itemsize
    est = (table_bytes * (1 if single_buffer_resident else 2)
           + 2 * tm * 128 * 4           # idx blocks (lane-padded (tm, 1) i32)
           + 2 * tm * d_pad * 4         # gathered-row output blocks
           + 3 * tm * e_pad * 4         # one-hot / match / iota temporaries
           + 4 * num_partials * e_pad * 4)
    vmem_limit = int(min(64 * 2**20, max(32 * 2**20, 2 * est)))

    def kernel(idx_ref, table_ref, out_ref, counts_ref):
        t = pl.program_id(1)

        ids = idx_ref[...]                                        # (TM, 1) int32
        eidx = lax.broadcasted_iota(jnp.int32, (tm, e_pad), 1)    # (TM, E_pad)
        match = ids == eidx                                       # (TM, E_pad) bool

        # Gather: one-hot matmul on the MXU. HIGH (bf16_3x) reconstructs the f32
        # table values to ~2^-18 relative error (each output element is a single
        # 1.0*value product, no accumulation rounding).
        onehot = match.astype(table_ref.dtype)
        out_ref[...] = jnp.dot(
            onehot, table_ref[...],
            preferred_element_type=jnp.float32,
            precision=precision,
        ).astype(out_ref.dtype)

        # Histogram for this token tile (XLU/VPU filler while the MXU gathers).
        tile_counts = jnp.sum(match.astype(jnp.int32), axis=0,
                              keepdims=True).reshape(1, 1, e_pad)

        @pl.when(t == 0)
        def _():
            counts_ref[...] = tile_counts

        @pl.when(t != 0)
        def _():
            counts_ref[...] = counts_ref[...] + tile_counts

    out_padded, partials = pl.pallas_call(
        kernel,
        out_shape=(
            jax.ShapeDtypeStruct((n_pad, d_pad), table_padded.dtype),
            jax.ShapeDtypeStruct((num_partials, 1, e_pad), jnp.int32),
        ),
        grid_spec=pltpu.PrefetchScalarGridSpec(
            num_scalar_prefetch=0,
            grid=(num_partials, t_steps),
            in_specs=[
                # Token tile for (super-block p, step t).
                pl.BlockSpec((tm, 1), lambda p, t: (p * t_steps + t, 0)),
                # Resident table (constant block index, single-buffered if possible).
                pl.BlockSpec((e_pad, d_pad), lambda p, t: (0, 0),
                             **table_spec_kwargs),
            ],
            out_specs=[
                # Gathered rows: lane-dense 128-multiple stores.
                pl.BlockSpec((tm, d_pad), lambda p, t: (p * t_steps + t, 0)),
                # Per-super-block partial histogram (resident across t).
                pl.BlockSpec((1, 1, e_pad), lambda p, t: (p, 0, 0)),
            ],
        ),
        compiler_params=pltpu.CompilerParams(
            dimension_semantics=("parallel", "arbitrary"),
            vmem_limit_bytes=vmem_limit,
        ),
    )(idx_pad, table_padded)

    # Crop only if needed (skip the extra HBM copy when already lane-aligned).
    if n_pad == n and d_pad == out_dim:
        out = out_padded
    else:
        out = out_padded[:n, :out_dim]
    out = out.reshape(indices.shape + (out_dim,))

    counts_new = counts_padded + jnp.sum(partials, axis=0)   # (1, E_pad) int32
    return out, counts_new


# ---------------------------------------------------------------------------
# Feature-fallback wrapper: try (Buffered(1), Precision.HIGH) first; fall back if
# the installed JAX rejects either. The winning config is cached.
# ---------------------------------------------------------------------------
_CONFIGS = (
    dict(single_buffer_resident=True, high_precision=True),
    dict(single_buffer_resident=True, high_precision=False),
    dict(single_buffer_resident=False, high_precision=True),
    dict(single_buffer_resident=False, high_precision=False),
)
_active_config = None


def fused_lookup_and_count(table_padded, counts_padded, indices, out_dim,
                           *, tm_max=2048, max_partials=2):
    """Returns (embeddings for `indices`, updated padded counts)."""
    global _active_config
    if _active_config is not None:
        return _fused_lookup_and_count_impl(
            table_padded, counts_padded, indices, out_dim=out_dim,
            tm_max=tm_max, max_partials=max_partials, **_active_config)

    last_err = None
    for cfg in _CONFIGS:
        try:
            out, counts = _fused_lookup_and_count_impl(
                table_padded, counts_padded, indices, out_dim=out_dim,
                tm_max=tm_max, max_partials=max_partials, **cfg)
            jax.block_until_ready((out, counts))
            _active_config = cfg
            return out, counts
        except Exception as e:  # noqa: BLE001 - feature-probe fallback
            last_err = e
    raise last_err


# ---------------------------------------------------------------------------
# Module-equivalent wrapper (parameters + mutable access_counts state).
# ---------------------------------------------------------------------------
class LoggingEmbedding:
    def __init__(self, num_embeddings, embedding_dim, key, dtype=jnp.float32):
        self.num_embeddings = num_embeddings
        self.embedding_dim = embedding_dim
        self._e_pad = _round_up(max(num_embeddings, 1), 128)
        self._d_pad = _round_up(max(embedding_dim, 1), 128)

        # nn.Embedding default init: weight ~ N(0, 1)
        self.weight = jax.random.normal(
            key, (num_embeddings, embedding_dim), dtype=dtype
        )
        # Lane-padded copy kept resident for the kernel (padded rows/cols = 0,
        # never selected since valid indices are < num_embeddings). Keep f32 so the
        # lookup is (near-)exact; switch to bf16 here for 2x VMEM / MXU headroom
        # if the product tolerates bf16 embeddings.
        self._weight_padded = (
            jnp.zeros((self._e_pad, self._d_pad), dtype=dtype)
            .at[:num_embeddings, :embedding_dim]
            .set(self.weight)
        )
        # TODO(synk): PyTorch keeps int64 counters; JAX default config is 32-bit,
        # so counts are int32 here (overflow only past ~2.1e9 hits per row).
        self._counts_padded = jnp.zeros((1, self._e_pad), dtype=jnp.int32)

    def forward(self, indices):
        # TODO(synk): out-of-range / negative indices silently return zero rows
        # instead of raising as PyTorch would.
        out, self._counts_padded = fused_lookup_and_count(
            self._weight_padded, self._counts_padded, indices, self.embedding_dim
        )
        return out

    def get_access_counts(self):
        return self._counts_padded[0, : self.num_embeddings]


if __name__ == "__main__":
    key = jax.random.PRNGKey(0)
    k_emb, k_idx = jax.random.split(key)

    num_embeddings = 64
    embedding_dim = 128
    batch, seq = 2, 8

    module = LoggingEmbedding(num_embeddings, embedding_dim, k_emb)
    indices = jax.random.randint(
        k_idx, (batch, seq), minval=0, maxval=num_embeddings, dtype=jnp.int32
    )

    # Two forward calls: checks both the gather and the stateful count accumulation.
    out1 = module.forward(indices)
    out2 = module.forward(indices)
    out2 = jax.block_until_ready(out2)
    counts = jax.block_until_ready(module.get_access_counts())

    # Reference checks (plain JAX).
    ref_out = jnp.take(module.weight, indices.reshape(-1), axis=0).reshape(
        batch, seq, embedding_dim
    )
    ref_counts = 2 * jnp.bincount(
        indices.reshape(-1), length=num_embeddings
    ).astype(jnp.int32)

    assert out1.shape == (batch, seq, embedding_dim)
    assert jnp.allclose(out1, ref_out, rtol=1e-5, atol=1e-5)
    assert jnp.allclose(out2, ref_out, rtol=1e-5, atol=1e-5)
    assert jnp.array_equal(counts, ref_counts)

    print("KERNEL_OK")
</pallas_src>

<mosaic_0001>
module attributes {stable_mosaic.version = 11 : i64} {
  func.func @kernel(%arg0: i32, %arg1: i32, %arg2: memref<16x1xi32, #tpu.memory_space<vmem>>, %arg3: memref<128x128xf32, #tpu.memory_space<vmem>>, %arg4: memref<16x128xf32, #tpu.memory_space<vmem>>, %arg5: memref<1x1x128xi32, #tpu.memory_space<vmem>>) attributes {dimension_semantics = [#tpu.dimension_semantics<parallel>, #tpu.dimension_semantics<arbitrary>], iteration_bounds = array<i64: 1, 1>, scalar_prefetch = 0 : i64, scratch_operands = 0 : i64, tpu.core_type = #tpu.core_type<tc>, window_params = [{transform_indices = @transform_0, window_bounds = array<i64: 16, 1>}, {pipeline_mode = #tpu.pipeline_mode<synchronous>, transform_indices = @transform_1, window_bounds = array<i64: 128, 128>}, {transform_indices = @transform_2, window_bounds = array<i64: 16, 128>}, {transform_indices = @transform_3, window_bounds = array<i64: 1, 1, 128>}]} {
    %c0 = arith.constant 0 : index
    %c0_0 = arith.constant 0 : index
    %0 = vector.load %arg2[%c0, %c0_0] : memref<16x1xi32, #tpu.memory_space<vmem>>, vector<16x1xi32>
    %1 = tpu.iota {dimensions = array<i32: 1>} : vector<16x128xi32>
    %2 = vector.broadcast %0 : vector<16x1xi32> to vector<16x128xi32>
    %3 = arith.cmpi eq, %2, %1 : vector<16x128xi32>
    %4 = arith.extui %3 : vector<16x128xi1> to vector<16x128xi32>
    %5 = arith.sitofp %4 : vector<16x128xi32> to vector<16x128xf32>
    %c0_1 = arith.constant 0 : index
    %c0_2 = arith.constant 0 : index
    %6 = vector.load %arg3[%c0_1, %c0_2] : memref<128x128xf32, #tpu.memory_space<vmem>>, vector<128x128xf32>
    %cst = arith.constant dense<0.000000e+00> : vector<16x128xf32>
    %7 = tpu.matmul %5, %6, %cst {dimension_numbers = #tpu.dot_dimension_numbers<[1], [0], [0], [1], [0, 0, 1, 1], [], []>, precision = #tpu.contract_precision<fp32>} : vector<16x128xf32>, vector<128x128xf32>, vector<16x128xf32> -> vector<16x128xf32>
    %c0_3 = arith.constant 0 : index
    %c0_4 = arith.constant 0 : index
    %8 = vector.load %arg4[%c0_3, %c0_4] : memref<16x128xf32, #tpu.memory_space<vmem>>, vector<16x128xf32>
    tpu.vector_store %arg4[%c0_3, %c0_4], %7 {strides = array<i32>} : memref<16x128xf32, #tpu.memory_space<vmem>>, vector<16x128xf32>,
    %9 = arith.extui %3 : vector<16x128xi1> to vector<16x128xi32>
    %cst_5 = arith.constant dense<0> : vector<128xi32>
    %10 = vector.multi_reduction <add>, %9, %cst_5 [0] : vector<16x128xi32> to vector<128xi32>
    %11 = vector.shape_cast %10 : vector<128xi32> to vector<1x128xi32>
    %12 = vector.shape_cast %11 : vector<1x128xi32> to vector<1x1x128xi32>
    %c0_i32 = arith.constant 0 : i32
    %13 = arith.cmpi eq, %arg1, %c0_i32 : i32
    %14 = arith.extui %13 : i1 to i32
    %c0_i32_6 = arith.constant 0 : i32
    %15 = arith.cmpi ne, %14, %c0_i32_6 : i32
    scf.if %15 {
      %c0_9 = arith.constant 0 : index
      %c0_10 = arith.constant 0 : index
      %c0_11 = arith.constant 0 : index
      %19 = vector.load %arg5[%c0_9, %c0_10, %c0_11] : memref<1x1x128xi32, #tpu.memory_space<vmem>>, vector<1x1x128xi32>
      tpu.vector_store %arg5[%c0_9, %c0_10, %c0_11], %12 {strides = array<i32>} : memref<1x1x128xi32, #tpu.memory_space<vmem>>, vector<1x1x128xi32>,
    } else {
    }
    %c0_i32_7 = arith.constant 0 : i32
    %16 = arith.cmpi ne, %arg1, %c0_i32_7 : i32
    %17 = arith.extui %16 : i1 to i32
    %c0_i32_8 = arith.constant 0 : i32
    %18 = arith.cmpi ne, %17, %c0_i32_8 : i32
    scf.if %18 {
      %c0_9 = arith.constant 0 : index
      %c0_10 = arith.constant 0 : index
      %c0_11 = arith.constant 0 : index
      %19 = vector.load %arg5[%c0_9, %c0_10, %c0_11] : memref<1x1x128xi32, #tpu.memory_space<vmem>>, vector<1x1x128xi32>
      %20 = arith.addi %19, %12 : vector<1x1x128xi32>
      %c0_12 = arith.constant 0 : index
      %c0_13 = arith.constant 0 : index
      %c0_14 = arith.constant 0 : index
      %21 = vector.load %arg5[%c0_12, %c0_13, %c0_14] : memref<1x1x128xi32, #tpu.memory_space<vmem>>, vector<1x1x128xi32>
      tpu.vector_store %arg5[%c0_12, %c0_13, %c0_14], %20 {strides = array<i32>} : memref<1x1x128xi32, #tpu.memory_space<vmem>>, vector<1x1x128xi32>,
    } else {
    }
    return
  }
  func.func @transform_0(%arg0: i32, %arg1: i32) -> (i32, i32) {
    %c1_i32 = arith.constant 1 : i32
    %0 = arith.muli %arg0, %c1_i32 : i32
    %1 = arith.addi %0, %arg1 : i32
    %c0_i32 = arith.constant 0 : i32
    %c0_i32_0 = arith.constant 0 : i32
    return %1, %c0_i32 : i32, i32
  }
  func.func @transform_1(%arg0: i32, %arg1: i32) -> (i32, i32) {
    %c0_i32 = arith.constant 0 : i32
    %c0_i32_0 = arith.constant 0 : i32
    %c0_i32_1 = arith.constant 0 : i32
    return %c0_i32, %c0_i32_0 : i32, i32
  }
  func.func @transform_2(%arg0: i32, %arg1: i32) -> (i32, i32) {
    %c1_i32 = arith.constant 1 : i32
    %0 = arith.muli %arg0, %c1_i32 : i32
    %1 = arith.addi %0, %arg1 : i32
    %c0_i32 = arith.constant 0 : i32
    %c0_i32_0 = arith.constant 0 : i32
    return %1, %c0_i32 : i32, i32
  }
  func.func @transform_3(%arg0: i32, %arg1: i32) -> (i32, i32, i32) {
    %c0_i32 = arith.constant 0 : i32
    %c0_i32_0 = arith.constant 0 : i32
    %c0_i32_1 = arith.constant 0 : i32
    return %arg0, %c0_i32, %c0_i32_0 : i32, i32, i32
  }
}

module attributes {stable_mosaic.version = 11 : i64} {
  func.func @kernel(%arg0: i32, %arg1: i32, %arg2: memref<16x1xi32, #tpu.memory_space<vmem>>, %arg3: memref<128x128xf32, #tpu.memory_space<vmem>>, %arg4: memref<16x128xf32, #tpu.memory_space<vmem>>, %arg5: memref<1x1x128xi32, #tpu.memory_space<vmem>>) attributes {dimension_semantics = [#tpu.dimension_semantics<parallel>, #tpu.dimension_semantics<arbitrary>], iteration_bounds = array<i64: 1, 1>, scalar_prefetch = 0 : i64, scratch_operands = 0 : i64, tpu.core_type = #tpu.core_type<tc>, window_params = [{transform_indices = @transform_0, window_bounds = array<i64: 16, 1>}, {pipeline_mode = #tpu.pipeline_mode<synchronous>, transform_indices = @transform_1, window_bounds = array<i64: 128, 128>}, {transform_indices = @transform_2, window_bounds = array<i64: 16, 128>}, {transform_indices = @transform_3, window_bounds = array<i64: 1, 1, 128>}]} {
    %c0 = arith.constant 0 : index
    %c0_0 = arith.constant 0 : index
    %0 = vector.load %arg2[%c0, %c0_0] : memref<16x1xi32, #tpu.memory_space<vmem>>, vector<16x1xi32>
    %1 = tpu.iota {dimensions = array<i32: 1>} : vector<16x128xi32>
    %2 = vector.broadcast %0 : vector<16x1xi32> to vector<16x128xi32>
    %3 = arith.cmpi eq, %2, %1 : vector<16x128xi32>
    %4 = arith.extui %3 : vector<16x128xi1> to vector<16x128xi32>
    %5 = arith.sitofp %4 : vector<16x128xi32> to vector<16x128xf32>
    %c0_1 = arith.constant 0 : index
    %c0_2 = arith.constant 0 : index
    %6 = vector.load %arg3[%c0_1, %c0_2] : memref<128x128xf32, #tpu.memory_space<vmem>>, vector<128x128xf32>
    %cst = arith.constant dense<0.000000e+00> : vector<16x128xf32>
    %7 = tpu.matmul %5, %6, %cst {dimension_numbers = #tpu.dot_dimension_numbers<[1], [0], [0], [1], [0, 0, 1, 1], [], []>, precision = #tpu.contract_precision<fp32>} : vector<16x128xf32>, vector<128x128xf32>, vector<16x128xf32> -> vector<16x128xf32>
    %c0_3 = arith.constant 0 : index
    %c0_4 = arith.constant 0 : index
    %8 = vector.load %arg4[%c0_3, %c0_4] : memref<16x128xf32, #tpu.memory_space<vmem>>, vector<16x128xf32>
    tpu.vector_store %arg4[%c0_3, %c0_4], %7 {strides = array<i32>} : memref<16x128xf32, #tpu.memory_space<vmem>>, vector<16x128xf32>,
    %9 = arith.extui %3 : vector<16x128xi1> to vector<16x128xi32>
    %cst_5 = arith.constant dense<0> : vector<128xi32>
    %10 = vector.multi_reduction <add>, %9, %cst_5 [0] : vector<16x128xi32> to vector<128xi32>
    %11 = vector.shape_cast %10 : vector<128xi32> to vector<1x128xi32>
    %12 = vector.shape_cast %11 : vector<1x128xi32> to vector<1x1x128xi32>
    %c0_i32 = arith.constant 0 : i32
    %13 = arith.cmpi eq, %arg1, %c0_i32 : i32
    %14 = arith.extui %13 : i1 to i32
    %c0_i32_6 = arith.constant 0 : i32
    %15 = arith.cmpi ne, %14, %c0_i32_6 : i32
    scf.if %15 {
      %c0_9 = arith.constant 0 : index
      %c0_10 = arith.constant 0 : index
      %c0_11 = arith.constant 0 : index
      %19 = vector.load %arg5[%c0_9, %c0_10, %c0_11] : memref<1x1x128xi32, #tpu.memory_space<vmem>>, vector<1x1x128xi32>
      tpu.vector_store %arg5[%c0_9, %c0_10, %c0_11], %12 {strides = array<i32>} : memref<1x1x128xi32, #tpu.memory_space<vmem>>, vector<1x1x128xi32>,
    } else {
    }
    %c0_i32_7 = arith.constant 0 : i32
    %16 = arith.cmpi ne, %arg1, %c0_i32_7 : i32
    %17 = arith.extui %16 : i1 to i32
    %c0_i32_8 = arith.constant 0 : i32
    %18 = arith.cmpi ne, %17, %c0_i32_8 : i32
    scf.if %18 {
      %c0_9 = arith.constant 0 : index
      %c0_10 = arith.constant 0 : index
      %c0_11 = arith.constant 0 : index
      %19 = vector.load %arg5[%c0_9, %c0_10, %c0_11] : memref<1x1x128xi32, #tpu.memory_space<vmem>>, vector<1x1x128xi32>
      %20 = arith.addi %19, %12 : vector<1x1x128xi32>
      %c0_12 = arith.constant 0 : index
      %c0_13 = arith.constant 0 : index
      %c0_14 = arith.constant 0 : index
      %21 = vector.load %arg5[%c0_12, %c0_13, %c0_14] : memref<1x1x128xi32, #tpu.memory_space<vmem>>, vector<1x1x128xi32>
      tpu.vector_store %arg5[%c0_12, %c0_13, %c0_14], %20 {strides = array<i32>} : memref<1x1x128xi32, #tpu.memory_space<vmem>>, vector<1x1x128xi32>,
    } else {
    }
    return
  }
  func.func @transform_0(%arg0: i32, %arg1: i32) -> (i32, i32) {
    %c1_i32 = arith.constant 1 : i32
    %0 = arith.muli %arg0, %c1_i32 : i32
    %1 = arith.addi %0, %arg1 : i32
    %c0_i32 = arith.constant 0 : i32
    %c0_i32_0 = arith.constant 0 : i32
    return %1, %c0_i32 : i32, i32
  }
  func.func @transform_1(%arg0: i32, %arg1: i32) -> (i32, i32) {
    %c0_i32 = arith.constant 0 : i32
    %c0_i32_0 = arith.constant 0 : i32
    %c0_i32_1 = arith.constant 0 : i32
    return %c0_i32, %c0_i32_0 : i32, i32
  }
  func.func @transform_2(%arg0: i32, %arg1: i32) -> (i32, i32) {
    %c1_i32 = arith.constant 1 : i32
    %0 = arith.muli %arg0, %c1_i32 : i32
    %1 = arith.addi %0, %arg1 : i32
    %c0_i32 = arith.constant 0 : i32
    %c0_i32_0 = arith.constant 0 : i32
    return %1, %c0_i32 : i32, i32
  }
  func.func @transform_3(%arg0: i32, %arg1: i32) -> (i32, i32, i32) {
    %c0_i32 = arith.constant 0 : i32
    %c0_i32_0 = arith.constant 0 : i32
    %c0_i32_1 = arith.constant 0 : i32
    return %arg0, %c0_i32, %c0_i32_0 : i32, i32, i32
  }
}

</mosaic_0001>

<bundles_post_ra>
// kernel: _fused_lookup_and_count_impl.1
= control target key start
LH: loop header
LB: loop body
LE: loop exit
PB: predicated region body
PF: predicated region fallthrough
CT: control target
= control target key end

     0   :  { %9 = vsyncpa [#allocation3], 0  ;;  %s1739_s0 = inlined_call_operand.vmem [shape: s32[16,1], index: 0, kind: input, shape index: {}]   ;;  %s1740_s1 = inlined_call_operand.hbm [shape: f32[128,128], index: 1, kind: input, shape index: {}]   ;;  %s1741_s2 = inlined_call_operand.hbm [shape: f32[16,128], index: 2, kind: output, shape index: {0}]   ;;  %s1742_s3 = inlined_call_operand.vmem [shape: s32[1,1,128], index: 3, kind: output, shape index: {1}]  }
   0x1   :  { %10 = vsyncpa [#allocation4], 0  ;;  %s1404_s12 = smov [#allocation2]   ;;  %s1356_s16 = scalar_lea.hbm %s1740_s1, 2048 }
   0x2   :  { %s26_s13 = sshll.u32 %s1404_s12, 4  ;;  %p1357_p0 = scmp.ne.s32.totalorder %s1740_s1, %s1356_s16  ;;  %s27_s13 = int_to_ptr.vmem [resolvable:$true] %s26_s13 }
   0x3   :  { %p1360_p1 = scmp.lt.u32.totalorder %s1356_s16, %s1740_s1 }
   0x5   :  { %p1362_p2 = pnand %p1360_p1, %p1357_p0 }
   0x7   :  { %1365 = shalt.err (!%p1362_p2)
}
   0x8   :  { %s1366_s21 = scalar_lea.vmem %s27_s13, 2048  ;;  %p1371_p4 = scmp.lt.s32.totalorder %s27_s13, %s27_s13 }
   0x9   :  { %p1367_p3 = scmp.ne.s32.totalorder %s27_s13, %s1366_s21  ;;  %p1372_p5 = scmp.lt.s32.totalorder %s1366_s21, %s1366_s21 }
   0xb   :  { %p1373_p6 = por %p1372_p5, %p1371_p4 }
   0xd   :  { %p1374_p7 = pnand %p1373_p6, %p1367_p3 }
   0xf   :  { %1377 = shalt.err (!%p1374_p7)
}
  0x10   :  { %s1405_s22 = smov 128   ;;  %s1406_s23 = smov 8  }
  0x11   :  { %32 = dma.hbm_to_vmem [thread:$0]  %s1740_s1, 2048, %s27_s13, [#allocation3], %s1405_s22, %s1405_s22, %s1406_s23  }
  0x12   :  { %1400 = dma.done.wait [#allocation3], 2048  }
  0x13   :  { %1401 = vsyncadd [#allocation3], 4294965248  ;;  %v1407_v0 = vmov 0   ;;  %v52_v1 = vld [vmem:[%s1739_s0] sm:$0xff]  ;;  %v69_v3 = vld [vmem:[#allocation2 + $0x8] sm:$0xff] }
  0x14   :  { %1355 = vset.pattern.permute.xlu0 %v1407_v0  ;;  %v68_v2 = vld [vmem:[#allocation2] sm:$0xff]  ;;  %v70_v5 = vld [vmem:[#allocation2 + $0x10] sm:$0xff]  ;;  %v71_v6 = vld [vmem:[#allocation2 + $0x18] sm:$0xff]  ;;  %v88_v8 = vand.u32 4294901760, %v69_v3 }
  0x15   :  { %57 = vperm.xlu0 %1355, %v52_v1   ;;  %v85_v4 = vand.u32 4294901760, %v68_v2  ;;  %v53_v7 = vld [vmem:[%s1739_s0 + $0x8] sm:$0xff]  ;;  %v91_v9 = vand.u32 4294901760, %v70_v5  ;;  %v94_v10 = vand.u32 4294901760, %v71_v6  ;;  %v72_v11 = vld [vmem:[#allocation2 + $0x20] sm:$0xff]  ;;  %v74_v17 = vld [vmem:[#allocation2 + $0x30] sm:$0xff] }
  0x16   :  { %v73_v12 = vld [vmem:[#allocation2 + $0x28] sm:$0xff]  ;;  %v97_v15 = vand.u32 4294901760, %v72_v11  ;;  %v75_v18 = vld [vmem:[#allocation2 + $0x38] sm:$0xff]  ;;  %v103_v20 = vand.u32 4294901760, %v74_v17  ;;  %v76_v22 = vld [vmem:[#allocation2 + $0x40] sm:$0xff]  ;;  %v1503_v46 = vsub.f32 %v69_v3, %v88_v8 }
  0x17   :  { %v1453_v13 = vpack.c.bf16 %v88_v8, %v85_v4  ;;  %v1455_v14 = vpack.c.bf16 %v94_v10, %v91_v9  ;;  %v100_v16 = vand.u32 4294901760, %v73_v12  ;;  %v106_v21 = vand.u32 4294901760, %v75_v18  ;;  %v77_v23 = vld [vmem:[#allocation2 + $0x48] sm:$0xff]  ;;  %v1471_v28 = vld [vmem:[#allocation2 + $0x50] sm:$0xff]  ;;  %v1479_v32 = vld [vmem:[#allocation2 + $0x58] sm:$0xff] }
  0x18   :  { %v1465_v24 = vsub.f32 %v70_v5, %v91_v9  ;;  %v1467_v25 = vsub.f32 %v71_v6, %v94_v10  ;;  %v109_v26 = vand.u32 4294901760, %v76_v22  ;;  %v112_v27 = vand.u32 4294901760, %v77_v23  ;;  %v1495_v41 = vld [vmem:[#allocation2 + $0x60] sm:$0xff]  ;;  %v1499_v44 = vld [vmem:[#allocation2 + $0x68] sm:$0xff]  ;;  %v1523_v58 = vld [vmem:[#allocation2 + $0x70] sm:$0xff] }
  0x19   :  { %60 = vperm.xlu0 %1355, %v53_v7   ;;  %1243 = vmatprep.subr.bf16.mxu0 %v1453_v13  ;;  %v1463_v19 = vpack.c.bf16 %v100_v16, %v97_v15  ;;  %v1477_v31 = vpack.c.bf16 %v106_v21, %v103_v20  ;;  %v115_v36 = vand.u32 4294901760, %v1471_v28  ;;  %v1486_v37 = vsub.f32 %v72_v11, %v97_v15  ;;  %v83_v61 = vld [vmem:[#allocation2 + $0x78] sm:$0xff] }
  0x1a   :  { %1147 = vmatprep.subr.bf16.mxu1 %v1453_v13  ;;  %1245 = vmatpush3.bf16.msra.mxu0 %v1453_v13  ;;  %v202_v29 = vand.u32 4294901760, %v1465_v24  ;;  %v209_v30 = vand.u32 4294901760, %v1467_v25  ;;  %v1488_v38 = vsub.f32 %v73_v12, %v100_v16  ;;  %v1492_v39 = vpack.c.bf16 %v112_v27, %v109_v26 }
  0x1b   :  { %1149 = vmatpush3.bf16.msra.mxu1 %v1453_v13  ;;  %1247 = vmatprep.subr.bf16.mxu0 %v1455_v14  ;;  %v118_v40 = vand.u32 4294901760, %v1479_v32  ;;  %v1501_v45 = vsub.f32 %v68_v2, %v85_v4  ;;  %v216_v47 = vand.u32 4294901760, %v1486_v37  ;;  %v1509_v50 = vsub.f32 %v74_v17, %v103_v20 }
  0x1c   :  { %1151 = vmatprep.subr.bf16.mxu1 %v1455_v14  ;;  %v1481_v33 = vpack.c.bf16 %v209_v30, %v202_v29  ;;  %v203_v34 = vsub.f32 %v1465_v24, %v202_v29  ;;  %v210_v35 = vsub.f32 %v1467_v25, %v209_v30  ;;  %v223_v48 = vand.u32 4294901760, %v1488_v38 }
  0x1d   :  { %v1511_v51 = vsub.f32 %v75_v18, %v106_v21  ;;  %v121_v52 = vand.u32 4294901760, %v1495_v41  ;;  %v217_v54 = vsub.f32 %v1486_v37, %v216_v47  ;;  %v1520_v56 = vpack.c.bf16 %v118_v40, %v115_v36 }
  0x1e   :  { %1249 = vmatpush3.bf16.msra.mxu0 %v1455_v14  ;;  %v204_v42 = vand.u32 4294901760, %v203_v34  ;;  %v211_v43 = vand.u32 4294901760, %v210_v35  ;;  %v1514_v53 = vpack.c.bf16 %v223_v48, %v216_v47  ;;  %v224_v55 = vsub.f32 %v1488_v38, %v223_v48 }
  0x1f   :  { %1153 = vmatpush3.bf16.msra.mxu1 %v1455_v14  ;;  %1251 = vmatprep.subr.bf16.mxu0 %v1463_v19  ;;  %v124_v57 = vand.u32 4294901760, %v1499_v44  ;;  %v230_v59 = vand.u32 4294901760, %v1509_v50  ;;  %v237_v60 = vand.u32 4294901760, %v1511_v51  ;;  %v188_v62 = vand.u32 4294901760, %v1501_v45 }
  0x20   :  { %1155 = vmatprep.subr.bf16.mxu1 %v1463_v19  ;;  %v1507_v49 = vpack.c.bf16 %v211_v43, %v204_v42  ;;  %v195_v63 = vand.u32 4294901760, %v1503_v46  ;;  %v218_v1 = vand.u32 4294901760, %v217_v54  ;;  %v225_v2 = vand.u32 4294901760, %v224_v55 }
  0x21   :  { %v1531_v3 = vpack.c.bf16 %v237_v60, %v230_v59  ;;  %v231_v4 = vsub.f32 %v1509_v50, %v230_v59  ;;  %v238_v5 = vsub.f32 %v1511_v51, %v237_v60  ;;  %v1535_v6 = vsub.f32 %v76_v22, %v109_v26 }
  0x22   :  { %1253 = vmatpush3.bf16.msra.mxu0 %v1463_v19  ;;  %v127_v7 = vand.u32 4294901760, %v1523_v58  ;;  %v1538_v8 = vpack.c.bf16 %v225_v2, %v218_v1  ;;  %v1540_v9 = vsub.f32 %v77_v23, %v112_v27  ;;  %v130_v10 = vand.u32 4294901760, %v83_v61 }
  0x23   :  { %1157 = vmatpush3.bf16.msra.mxu1 %v1463_v19  ;;  %1255 = vmatprep.subr.bf16.mxu0 %v1477_v31  ;;  %v232_v11 = vand.u32 4294901760, %v231_v4  ;;  %v239_v12 = vand.u32 4294901760, %v238_v5  ;;  %v244_v15 = vand.u32 4294901760, %v1535_v6  ;;  %v1547_v16 = vpack.c.bf16 %v124_v57, %v121_v52 }
  0x24   :  { %1159 = vmatprep.subr.bf16.mxu1 %v1477_v31  ;;  %v189_v17 = vsub.f32 %v1501_v45, %v188_v62  ;;  %v196_v18 = vsub.f32 %v1503_v46, %v195_v63  ;;  %v251_v20 = vand.u32 4294901760, %v1540_v9  ;;  %v257_v23 = vsub.f32 %v1471_v28, %v115_v36 }
  0x25   :  { %v1552_v21 = vpack.c.bf16 %v239_v12, %v232_v11  ;;  %v245_v22 = vsub.f32 %v1535_v6, %v244_v15  ;;  %v264_v26 = vsub.f32 %v1479_v32, %v118_v40  ;;  %v1564_v42 = vpack.c.bf16 %v130_v10, %v127_v7 }
  0x26   :  { %1257 = vmatpush3.bf16.msra.mxu0 %v1477_v31  ;;  %v1557_v27 = vpack.c.bf16 %v251_v20, %v244_v15  ;;  %v252_v29 = vsub.f32 %v1540_v9, %v251_v20  ;;  %v258_v34 = vand.u32 4294901760, %v257_v23  ;;  %v190_v28 = vand.u32 4294901760, %v189_v17 }
  0x27   :  { %1161 = vmatpush3.bf16.msra.mxu1 %v1477_v31  ;;  %1259 = vmatprep.subr.bf16.mxu0 %v1492_v39  ;;  %v246_v30 = vand.u32 4294901760, %v245_v22  ;;  %v265_v35 = vand.u32 4294901760, %v264_v26  ;;  %v197_v36 = vand.u32 4294901760, %v196_v18  ;;  %v271_v48 = vsub.f32 %v1495_v41, %v121_v52 }
  0x28   :  { %1163 = vmatprep.subr.bf16.mxu1 %v1492_v39  ;;  %v253_v32 = vand.u32 4294901760, %v252_v29  ;;  %v259_v43 = vsub.f32 %v257_v23, %v258_v34  ;;  %v278_v55 = vsub.f32 %v1499_v44, %v124_v57  ;;  %v1274_v2 = vpack.c.bf16 %v195_v63, %v188_v62 }
  0x29   :  { %v1566_v40 = vpack.c.bf16 %v265_v35, %v258_v34  ;;  %v266_v47 = vsub.f32 %v264_v26, %v265_v35  ;;  %v272_v1 = vand.u32 4294901760, %v271_v48  ;;  %v1178_v4 = vpack.c.bf16 %v197_v36, %v190_v28 }
  0x2a   :  { %1261 = vmatpush3.bf16.msra.mxu0 %v1492_v39  ;;  %v1569_v54 = vpack.c.bf16 %v253_v32, %v246_v30  ;;  %v260_v59 = vand.u32 4294901760, %v259_v43  ;;  %v279_v5 = vand.u32 4294901760, %v278_v55  ;;  %v285_v52 = vsub.f32 %v1523_v58, %v127_v7 }
  0x2b   :  { %1165 = vmatpush3.bf16.msra.mxu1 %v1492_v39  ;;  %1263 = vmatprep.subr.bf16.mxu0 %v1520_v56  ;;  %v267_v60 = vand.u32 4294901760, %v266_v47  ;;  %v273_v41 = vsub.f32 %v271_v48, %v272_v1  ;;  %v292_v44 = vsub.f32 %v83_v61, %v130_v10  ;;  %v1591_v10 = vpack.c.bf16 %v1503_v46, %v1501_v45 }
  0x2c   :  { %1167 = vmatprep.subr.bf16.mxu1 %v1520_v56  ;;  %v1579_v57 = vpack.c.bf16 %v279_v5, %v272_v1  ;;  %v280_v12 = vsub.f32 %v278_v55, %v279_v5  ;;  %v286_v17 = vand.u32 4294901760, %v285_v52  ;;  %v1595_v30 = vpack.c.bf16 %v1467_v25, %v1465_v24 }
  0x2d   :  { %v1576_v11 = vpack.c.bf16 %v267_v60, %v260_v59  ;;  %v274_v15 = vand.u32 4294901760, %v273_v41  ;;  %v293_v18 = vand.u32 4294901760, %v292_v44  ;;  %v1599_v34 = vpack.c.bf16 %v1488_v38, %v1486_v37 }
  0x2e   :  { %1265 = vmatpush3.bf16.msra.mxu0 %v1520_v56  ;;  %v281_v62 = vand.u32 4294901760, %v280_v12  ;;  %v287_v20 = vsub.f32 %v285_v52, %v286_v17  ;;  %v1603_v35 = vpack.c.bf16 %v1511_v51, %v1509_v50  ;;  %v1607_v28 = vpack.c.bf16 %v1540_v9, %v1535_v6 }
  0x2f   :  { %1169 = vmatpush3.bf16.msra.mxu1 %v1520_v56  ;;  %1267 = vmatprep.subr.bf16.mxu0 %v1547_v16  ;;  %v1583_v63 = vpack.c.bf16 %v293_v18, %v286_v17  ;;  %v294_v22 = vsub.f32 %v292_v44, %v293_v18  ;;  %v1609_v36 = vpack.c.bf16 %v264_v26, %v257_v23  ;;  %v54_v24 = vlaneseq }
  0x30   :  { %1171 = vmatprep.subr.bf16.mxu1 %v1547_v16  ;;  %v1585_v29 = vpack.c.bf16 %v281_v62, %v274_v15  ;;  %v288_v58 = vand.u32 4294901760, %v287_v20  ;;  %v1611_v45 = vpack.c.bf16 %v278_v55, %v271_v48  ;;  %v1613_v46 = vpack.c.bf16 %v292_v44, %v285_v52 }
  0x31   :  { %v295_v61 = vand.u32 4294901760, %v294_v22  ;;  %v55_v25 = vand.u32 127, %v54_v24  ;;  %v1408_v38 = vmov 0.0  }
  0x32   :  { %1269 = vmatpush3.bf16.msra.mxu0 %v1547_v16 }
  0x33   :  { %1173 = vmatpush3.bf16.msra.mxu1 %v1547_v16  ;;  %1271 = vmatprep.subr.bf16.mxu0 %v1564_v42  ;;  %v1587_v7 = vpack.c.bf16 %v295_v61, %v288_v58 }
  0x34   :  { %1175 = vmatprep.subr.bf16.mxu1 %v1564_v42 }
  0x36   :  { %1273 = vmatpush3.bf16.msra.mxu0 %v1564_v42 }
  0x37   :  { %1177 = vmatpush3.bf16.msra.mxu1 %v1564_v42  ;;  %1275 = vmatprep.subr.bf16.mxu0 %v1274_v2 }
  0x38   :  { %1179 = vmatprep.subr.bf16.mxu1 %v1178_v4 }
  0x94   :  { %v58_v32 = vpop.permute.xlu0 %57 }
  0x95   :  { %vm1615_vm0 = vcmp.eq.s32.totalorder %v58_v32, %v55_v25 }
  0x96   :  { %v820_v50 = vsel %vm1615_vm0, 1.0, %v1408_v38  ;;  %v64_v26 = vsel %vm1615_vm0, 1, %v1407_v0 }
  0x97   :  { %v1621_v51 = vsub.f32 %v820_v50, %v820_v50 }
  0x98   :  { %v61_v6 = vpop.permute.xlu0 %60 }
  0x99   :  { %vm1623_vm1 = vcmp.eq.s32.totalorder %v61_v6, %v55_v25  ;;  %v167_v23 = vand.u32 4294901760, %v1621_v51 }
  0x9a   :  { %v65_v43 = vsel %vm1623_vm1, 1, %v1407_v0  ;;  %v821_v47 = vsel %vm1623_vm1, 1.0, %v1408_v38  ;;  %v1409_v0 = vmov 1.0  }
  0x9b   :  { %v1636_v48 = vsub.f32 %v821_v47, %v821_v47  ;;  %v770_v55 = vadd.s32 %v65_v43, %v64_v26  ;;  %1073 = vmatprep.mubr.f32.mxu0 %v167_v23  ;;  %v168_v59 = vsub.f32 %v1621_v51, %v167_v23 }
  0x9d   :  { %v771_v60 = vrot.slane %v770_v55, 4  ;;  %v169_v1 = vand.u32 4294901760, %v168_v59  ;;  %v177_v5 = vand.u32 4294901760, %v1636_v48 }
  0x9f   :  { %v772_v41 = vadd.s32 %v771_v60, %v770_v55  ;;  %968 = vmatprep.mubr.f32.mxu1 %v169_v1  ;;  %1074 = vmatmul.mubr.f32.vlgmr.msra.gmra.mrb[0].mxu0 %v177_v5  ;;  %v178_v52 = vsub.f32 %v1636_v48, %v177_v5 }
  0xa0   :  { %1277 = vmatpush3.bf16.msra.mxu0 %v1274_v2  ;;  %1108 = vmatprep.mubr.msk.f32.mxu0 %vm1615_vm0, %v1409_v0 }
  0xa1   :  { %v773_v44 = vrot.slane %v772_v41, 2  ;;  %1279 = vmatprep.subr.bf16.mxu0 %v1481_v33  ;;  %v179_v12 = vand.u32 4294901760, %v178_v52 }
  0xa3   :  { %v774_v15 = vadd.s32 %v773_v44, %v772_v41  ;;  %969 = vmatmul.mubr.f32.vlgmr.msra.gmra.mrb[0].mxu1 %v179_v12 }
  0xa4   :  { %1181 = vmatpush3.bf16.msra.mxu1 %v1178_v4  ;;  %1281 = vmatpush3.bf16.msra.mxu0 %v1481_v33 }
  0xa5   :  { %v775_v17 = vrot.slane %v774_v15, 1  ;;  %1003 = vmatprep.mubr.msk.f32.mxu1 %vm1615_vm0, %v1409_v0  ;;  %1183 = vmatprep.subr.bf16.mxu1 %v1507_v49 }
  0xa6   :  { %1283 = vmatprep.subr.bf16.mxu0 %v1514_v53 }
  0xa7   :  { %v776_v2 = vadd.s32 %v775_v17, %v774_v15 }
  0xa8   :  { %1185 = vmatpush3.bf16.msra.mxu1 %v1507_v49  ;;  %1285 = vmatpush3.bf16.msra.mxu0 %v1514_v53 }
  0xa9   :  { %781 = vst [vmem:[%s1742_s3] sm:$0x1] %v776_v2  ;;  %1187 = vmatprep.subr.bf16.mxu1 %v1538_v8  ;;  %1287 = vmatprep.subr.bf16.mxu0 %v1531_v3  ;;  %s1410_s3 = smov [#allocation5]  }
  0xaa   :  { %s798_s30 = sshll.u32 %s1410_s3, 4  ;;  %s799_s30 = int_to_ptr.vmem [resolvable:$true] %s798_s30 }
  0xab   :  { %s1378_s4 = scalar_lea.vmem %s799_s30, 256  ;;  %p1383_p9 = scmp.lt.s32.totalorder %s799_s30, %s799_s30 }
  0xac   :  { %1189 = vmatpush3.bf16.msra.mxu1 %v1538_v8  ;;  %1289 = vmatpush3.bf16.msra.mxu0 %v1531_v3  ;;  %p1379_p8 = scmp.ne.s32.totalorder %s799_s30, %s1378_s4  ;;  %p1384_p10 = scmp.lt.s32.totalorder %s1378_s4, %s1378_s4 }
  0xad   :  { %1191 = vmatprep.subr.bf16.mxu1 %v1552_v21  ;;  %1291 = vmatprep.subr.bf16.mxu0 %v1557_v27 }
  0xae   :  { %p1385_p11 = por %p1384_p10, %p1383_p9 }
  0xb0   :  { %1193 = vmatpush3.bf16.msra.mxu1 %v1552_v21  ;;  %1293 = vmatpush3.bf16.msra.mxu0 %v1557_v27  ;;  %p1386_p12 = pnand %p1385_p11, %p1379_p8 }
  0xb1   :  { %1195 = vmatprep.subr.bf16.mxu1 %v1569_v54  ;;  %1295 = vmatprep.subr.bf16.mxu0 %v1566_v40 }
  0xb4   :  { %1197 = vmatpush3.bf16.msra.mxu1 %v1569_v54  ;;  %1297 = vmatpush3.bf16.msra.mxu0 %v1566_v40 }
  0xb5   :  { %1199 = vmatprep.subr.bf16.mxu1 %v1576_v11  ;;  %1299 = vmatprep.subr.bf16.mxu0 %v1579_v57 }
  0xb8   :  { %1201 = vmatpush3.bf16.msra.mxu1 %v1576_v11  ;;  %1301 = vmatpush3.bf16.msra.mxu0 %v1579_v57 }
  0xb9   :  { %1203 = vmatprep.subr.bf16.mxu1 %v1585_v29  ;;  %1303 = vmatprep.subr.bf16.mxu0 %v1583_v63 }
  0xbc   :  { %1205 = vmatpush3.bf16.msra.mxu1 %v1585_v29  ;;  %1305 = vmatpush3.bf16.msra.mxu0 %v1583_v63 }
  0xbd   :  { %1207 = vmatprep.subr.bf16.mxu1 %v1587_v7  ;;  %1307 = vmatprep.subr.bf16.mxu0 %v1453_v13 }
  0xbf   :  { %1109 = vmatmul.mubr.msk.f32.vlgmr.msra.gmra.mrb[0].mxu0 %vm1623_vm1, %v1409_v0 }
  0xc0   :  { %1209 = vmatpush3.bf16.msra.mxu1 %v1587_v7  ;;  %1309 = vmatpush3.bf16.msra.mxu0 %v1453_v13 }
  0xc1   :  { %1143 = vmatprep.mubr.msk.f32.mxu0 %vm1615_vm0, %v1409_v0  ;;  %1211 = vmatprep.subr.bf16.mxu1 %v1591_v10 }
  0xc2   :  { %1311 = vmatprep.subr.bf16.mxu0 %v1455_v14 }
  0xc3   :  { %1004 = vmatmul.mubr.msk.f32.vlgmr.msra.gmra.mrb[0].mxu1 %vm1623_vm1, %v1409_v0 }
  0xc4   :  { %1213 = vmatpush3.bf16.msra.mxu1 %v1591_v10  ;;  %1038 = vmatprep.mubr.f32.mxu1 %v1621_v51 }
  0xc5   :  { %1313 = vmatpush3.bf16.msra.mxu0 %v1455_v14  ;;  %1215 = vmatprep.subr.bf16.mxu1 %v1595_v30 }
  0xc6   :  { %1315 = vmatprep.subr.bf16.mxu0 %v1463_v19 }
  0xc8   :  { %1217 = vmatpush3.bf16.msra.mxu1 %v1595_v30 }
  0xc9   :  { %1317 = vmatpush3.bf16.msra.mxu0 %v1463_v19  ;;  %1219 = vmatprep.subr.bf16.mxu1 %v1599_v34 }
  0xca   :  { %1319 = vmatprep.subr.bf16.mxu0 %v1477_v31 }
  0xcc   :  { %1221 = vmatpush3.bf16.msra.mxu1 %v1599_v34 }
  0xcd   :  { %1321 = vmatpush3.bf16.msra.mxu0 %v1477_v31  ;;  %1223 = vmatprep.subr.bf16.mxu1 %v1603_v35 }
  0xce   :  { %1323 = vmatprep.subr.bf16.mxu0 %v1492_v39 }
  0xd0   :  { %1225 = vmatpush3.bf16.msra.mxu1 %v1603_v35 }
  0xd1   :  { %1325 = vmatpush3.bf16.msra.mxu0 %v1492_v39  ;;  %1227 = vmatprep.subr.bf16.mxu1 %v1607_v28 }
  0xd2   :  { %1327 = vmatprep.subr.bf16.mxu0 %v1520_v56 }
  0xd4   :  { %1229 = vmatpush3.bf16.msra.mxu1 %v1607_v28 }
  0xd5   :  { %1329 = vmatpush3.bf16.msra.mxu0 %v1520_v56  ;;  %1231 = vmatprep.subr.bf16.mxu1 %v1609_v36 }
  0xd6   :  { %1331 = vmatprep.subr.bf16.mxu0 %v1547_v16 }
  0xd8   :  { %1233 = vmatpush3.bf16.msra.mxu1 %v1609_v36 }
  0xd9   :  { %1333 = vmatpush3.bf16.msra.mxu0 %v1547_v16  ;;  %1235 = vmatprep.subr.bf16.mxu1 %v1611_v45 }
  0xda   :  { %1335 = vmatprep.subr.bf16.mxu0 %v1564_v42 }
  0xdc   :  { %1237 = vmatpush3.bf16.msra.mxu1 %v1611_v45 }
  0xdd   :  { %1337 = vmatpush3.bf16.msra.mxu0 %v1564_v42  ;;  %1239 = vmatprep.subr.bf16.mxu1 %v1613_v46 }
  0xe0   :  { %1144 = vmatmul.mubr.msk.f32.vlgmr.msra.gmra.mrb[0].mxu0 %vm1623_vm1, %v1409_v0  ;;  %1241 = vmatpush3.bf16.msra.mxu1 %v1613_v46 }
  0xe3   :  { %1039 = vmatmul.mubr.f32.vlgmr.msra.gmra.mrb[0].mxu1 %v1636_v48 }
 0x1b3   :  { %v1145_v13 = vpop.f32.mrb[0].mxu0 }
 0x1b4   :  { %v758_v14 = vpop.f32.mrb[1].mxu0 }
 0x1b6   :  { %v1040_v19 = vpop.f32.mrb[0].mxu1 }
 0x1b7   :  { %v1338_v31 = vadd.f32 %v1145_v13, %v1040_v19  ;;  %v442_v33 = vpop.f32.mrb[1].mxu1 }
 0x1b8   :  { %v1339_v39 = vadd.f32 %v758_v14, %v442_v33 }
 0x1b9   :  { %769 = vst [vmem:[#allocation5 + $0x8] sm:$0xff] %v1338_v31 }
 0x1ba   :  { %768 = vst [vmem:[#allocation5] sm:$0xff] %v1339_v39 }
 0x1bb   :  { %1389 = shalt.err (!%p1386_p12)
}
 0x1bc   :  { %s1390_s7 = scalar_lea.hbm %s1741_s2, 256 }
 0x1bd   :  { %p1391_p13 = scmp.ne.s32.totalorder %s1741_s2, %s1390_s7  ;;  %p1394_p0 = scmp.lt.u32.totalorder %s1390_s7, %s1741_s2 }
 0x1bf   :  { %p1396_p1 = pnand %p1394_p0, %p1391_p13 }
 0x1c1   :  { %1399 = shalt.err (!%p1396_p1)
}
 0x1c2   :  { %804 = dma.vmem_to_hbm [thread:$0]  %s799_s30, 256, %s1741_s2, [#allocation4], %s1405_s22, %s1405_s22, %s1406_s23  }
 0x1c3   :  { %1402 = dma.done.wait [#allocation4], 256  }
 0x1c4   :  { %1403 = vsyncadd [#allocation4], 4294967040 }
 0x1c5   :  { %812 = vsyncpa [#allocation3], 1 }
 0x1c6   :  { %813 = vsyncpa [#allocation4], 1 }

// kernel: _fused_lookup_and_count_impl.1
= control target key start
LH: loop header
LB: loop body
LE: loop exit
PB: predicated region body
PF: predicated region fallthrough
CT: control target
= control target key end

     0   :  { %9 = vsyncpa [#allocation3], 0  ;;  %s1739_s0 = inlined_call_operand.vmem [shape: s32[16,1], index: 0, kind: input, shape index: {}]   ;;  %s1740_s1 = inlined_call_operand.hbm [shape: f32[128,128], index: 1, kind: input, shape index: {}]   ;;  %s1741_s2 = inlined_call_operand.hbm [shape: f32[16,128], index: 2, kind: output, shape index: {0}]   ;;  %s1742_s3 = inlined_call_operand.vmem [shape: s32[1,1,128], index: 3, kind: output, shape index: {1}]  }
   0x1   :  { %10 = vsyncpa [#allocation4], 0  ;;  %s1404_s12 = smov [#allocation2]   ;;  %s1356_s16 = scalar_lea.hbm %s1740_s1, 2048 }
   0x2   :  { %s26_s13 = sshll.u32 %s1404_s12, 4  ;;  %p1357_p0 = scmp.ne.s32.totalorder %s1740_s1, %s1356_s16  ;;  %s27_s13 = int_to_ptr.vmem [resolvable:$true] %s26_s13 }
   0x3   :  { %p1360_p1 = scmp.lt.u32.totalorder %s1356_s16, %s1740_s1 }
   0x5   :  { %p1362_p2 = pnand %p1360_p1, %p1357_p0 }
   0x7   :  { %1365 = shalt.err (!%p1362_p2)
}
   0x8   :  { %s1366_s21 = scalar_lea.vmem %s27_s13, 2048  ;;  %p1371_p4 = scmp.lt.s32.totalorder %s27_s13, %s27_s13 }
   0x9   :  { %p1367_p3 = scmp.ne.s32.totalorder %s27_s13, %s1366_s21  ;;  %p1372_p5 = scmp.lt.s32.totalorder %s1366_s21, %s1366_s21 }
   0xb   :  { %p1373_p6 = por %p1372_p5, %p1371_p4 }
   0xd   :  { %p1374_p7 = pnand %p1373_p6, %p1367_p3 }
   0xf   :  { %1377 = shalt.err (!%p1374_p7)
}
  0x10   :  { %s1405_s22 = smov 128   ;;  %s1406_s23 = smov 8  }
  0x11   :  { %32 = dma.hbm_to_vmem [thread:$0]  %s1740_s1, 2048, %s27_s13, [#allocation3], %s1405_s22, %s1405_s22, %s1406_s23  }
  0x12   :  { %1400 = dma.done.wait [#allocation3], 2048  }
  0x13   :  { %1401 = vsyncadd [#allocation3], 4294965248  ;;  %v1407_v0 = vmov 0   ;;  %v52_v1 = vld [vmem:[%s1739_s0] sm:$0xff]  ;;  %v69_v3 = vld [vmem:[#allocation2 + $0x8] sm:$0xff] }
  0x14   :  { %1355 = vset.pattern.permute.xlu0 %v1407_v0  ;;  %v68_v2 = vld [vmem:[#allocation2] sm:$0xff]  ;;  %v70_v5 = vld [vmem:[#allocation2 + $0x10] sm:$0xff]  ;;  %v71_v6 = vld [vmem:[#allocation2 + $0x18] sm:$0xff]  ;;  %v88_v8 = vand.u32 4294901760, %v69_v3 }
  0x15   :  { %57 = vperm.xlu0 %1355, %v52_v1   ;;  %v85_v4 = vand.u32 4294901760, %v68_v2  ;;  %v53_v7 = vld [vmem:[%s1739_s0 + $0x8] sm:$0xff]  ;;  %v91_v9 = vand.u32 4294901760, %v70_v5  ;;  %v94_v10 = vand.u32 4294901760, %v71_v6  ;;  %v72_v11 = vld [vmem:[#allocation2 + $0x20] sm:$0xff]  ;;  %v74_v17 = vld [vmem:[#allocation2 + $0x30] sm:$0xff] }
  0x16   :  { %v73_v12 = vld [vmem:[#allocation2 + $0x28] sm:$0xff]  ;;  %v97_v15 = vand.u32 4294901760, %v72_v11  ;;  %v75_v18 = vld [vmem:[#allocation2 + $0x38] sm:$0xff]  ;;  %v103_v20 = vand.u32 4294901760, %v74_v17  ;;  %v76_v22 = vld [vmem:[#allocation2 + $0x40] sm:$0xff]  ;;  %v1503_v46 = vsub.f32 %v69_v3, %v88_v8 }
  0x17   :  { %v1453_v13 = vpack.c.bf16 %v88_v8, %v85_v4  ;;  %v1455_v14 = vpack.c.bf16 %v94_v10, %v91_v9  ;;  %v100_v16 = vand.u32 4294901760, %v73_v12  ;;  %v106_v21 = vand.u32 4294901760, %v75_v18  ;;  %v77_v23 = vld [vmem:[#allocation2 + $0x48] sm:$0xff]  ;;  %v1471_v28 = vld [vmem:[#allocation2 + $0x50] sm:$0xff]  ;;  %v1479_v32 = vld [vmem:[#allocation2 + $0x58] sm:$0xff] }
  0x18   :  { %v1465_v24 = vsub.f32 %v70_v5, %v91_v9  ;;  %v1467_v25 = vsub.f32 %v71_v6, %v94_v10  ;;  %v109_v26 = vand.u32 4294901760, %v76_v22  ;;  %v112_v27 = vand.u32 4294901760, %v77_v23  ;;  %v1495_v41 = vld [vmem:[#allocation2 + $0x60] sm:$0xff]  ;;  %v1499_v44 = vld [vmem:[#allocation2 + $0x68] sm:$0xff]  ;;  %v1523_v58 = vld [vmem:[#allocation2 + $0x70] sm:$0xff] }
  0x19   :  { %60 = vperm.xlu0 %1355, %v53_v7   ;;  %1243 = vmatprep.subr.bf16.mxu0 %v1453_v13  ;;  %v1463_v19 = vpack.c.bf16 %v100_v16, %v97_v15  ;;  %v1477_v31 = vpack.c.bf16 %v106_v21, %v103_v20  ;;  %v115_v36 = vand.u32 4294901760, %v1471_v28  ;;  %v1486_v37 = vsub.f32 %v72_v11, %v97_v15  ;;  %v83_v61 = vld [vmem:[#allocation2 + $0x78] sm:$0xff] }
  0x1a   :  { %1147 = vmatprep.subr.bf16.mxu1 %v1453_v13  ;;  %1245 = vmatpush3.bf16.msra.mxu0 %v1453_v13  ;;  %v202_v29 = vand.u32 4294901760, %v1465_v24  ;;  %v209_v30 = vand.u32 4294901760, %v1467_v25  ;;  %v1488_v38 = vsub.f32 %v73_v12, %v100_v16  ;;  %v1492_v39 = vpack.c.bf16 %v112_v27, %v109_v26 }
  0x1b   :  { %1149 = vmatpush3.bf16.msra.mxu1 %v1453_v13  ;;  %1247 = vmatprep.subr.bf16.mxu0 %v1455_v14  ;;  %v118_v40 = vand.u32 4294901760, %v1479_v32  ;;  %v1501_v45 = vsub.f32 %v68_v2, %v85_v4  ;;  %v216_v47 = vand.u32 4294901760, %v1486_v37  ;;  %v1509_v50 = vsub.f32 %v74_v17, %v103_v20 }
  0x1c   :  { %1151 = vmatprep.subr.bf16.mxu1 %v1455_v14  ;;  %v1481_v33 = vpack.c.bf16 %v209_v30, %v202_v29  ;;  %v203_v34 = vsub.f32 %v1465_v24, %v202_v29  ;;  %v210_v35 = vsub.f32 %v1467_v25, %v209_v30  ;;  %v223_v48 = vand.u32 4294901760, %v1488_v38 }
  0x1d   :  { %v1511_v51 = vsub.f32 %v75_v18, %v106_v21  ;;  %v121_v52 = vand.u32 4294901760, %v1495_v41  ;;  %v217_v54 = vsub.f32 %v1486_v37, %v216_v47  ;;  %v1520_v56 = vpack.c.bf16 %v118_v40, %v115_v36 }
  0x1e   :  { %1249 = vmatpush3.bf16.msra.mxu0 %v1455_v14  ;;  %v204_v42 = vand.u32 4294901760, %v203_v34  ;;  %v211_v43 = vand.u32 4294901760, %v210_v35  ;;  %v1514_v53 = vpack.c.bf16 %v223_v48, %v216_v47  ;;  %v224_v55 = vsub.f32 %v1488_v38, %v223_v48 }
  0x1f   :  { %1153 = vmatpush3.bf16.msra.mxu1 %v1455_v14  ;;  %1251 = vmatprep.subr.bf16.mxu0 %v1463_v19  ;;  %v124_v57 = vand.u32 4294901760, %v1499_v44  ;;  %v230_v59 = vand.u32 4294901760, %v1509_v50  ;;  %v237_v60 = vand.u32 4294901760, %v1511_v51  ;;  %v188_v62 = vand.u32 4294901760, %v1501_v45 }
  0x20   :  { %1155 = vmatprep.subr.bf16.mxu1 %v1463_v19  ;;  %v1507_v49 = vpack.c.bf16 %v211_v43, %v204_v42  ;;  %v195_v63 = vand.u32 4294901760, %v1503_v46  ;;  %v218_v1 = vand.u32 4294901760, %v217_v54  ;;  %v225_v2 = vand.u32 4294901760, %v224_v55 }
  0x21   :  { %v1531_v3 = vpack.c.bf16 %v237_v60, %v230_v59  ;;  %v231_v4 = vsub.f32 %v1509_v50, %v230_v59  ;;  %v238_v5 = vsub.f32 %v1511_v51, %v237_v60  ;;  %v1535_v6 = vsub.f32 %v76_v22, %v109_v26 }
  0x22   :  { %1253 = vmatpush3.bf16.msra.mxu0 %v1463_v19  ;;  %v127_v7 = vand.u32 4294901760, %v1523_v58  ;;  %v1538_v8 = vpack.c.bf16 %v225_v2, %v218_v1  ;;  %v1540_v9 = vsub.f32 %v77_v23, %v112_v27  ;;  %v130_v10 = vand.u32 4294901760, %v83_v61 }
  0x23   :  { %1157 = vmatpush3.bf16.msra.mxu1 %v1463_v19  ;;  %1255 = vmatprep.subr.bf16.mxu0 %v1477_v31  ;;  %v232_v11 = vand.u32 4294901760, %v231_v4  ;;  %v239_v12 = vand.u32 4294901760, %v238_v5  ;;  %v244_v15 = vand.u32 4294901760, %v1535_v6  ;;  %v1547_v16 = vpack.c.bf16 %v124_v57, %v121_v52 }
  0x24   :  { %1159 = vmatprep.subr.bf16.mxu1 %v1477_v31  ;;  %v189_v17 = vsub.f32 %v1501_v45, %v188_v62  ;;  %v196_v18 = vsub.f32 %v1503_v46, %v195_v63  ;;  %v251_v20 = vand.u32 4294901760, %v1540_v9  ;;  %v257_v23 = vsub.f32 %v1471_v28, %v115_v36 }
  0x25   :  { %v1552_v21 = vpack.c.bf16 %v239_v12, %v232_v11  ;;  %v245_v22 = vsub.f32 %v1535_v6, %v244_v15  ;;  %v264_v26 = vsub.f32 %v1479_v32, %v118_v40  ;;  %v1564_v42 = vpack.c.bf16 %v130_v10, %v127_v7 }
  0x26   :  { %1257 = vmatpush3.bf16.msra.mxu0 %v1477_v31  ;;  %v1557_v27 = vpack.c.bf16 %v251_v20, %v244_v15  ;;  %v252_v29 = vsub.f32 %v1540_v9, %v251_v20  ;;  %v258_v34 = vand.u32 4294901760, %v257_v23  ;;  %v190_v28 = vand.u32 4294901760, %v189_v17 }
  0x27   :  { %1161 = vmatpush3.bf16.msra.mxu1 %v1477_v31  ;;  %1259 = vmatprep.subr.bf16.mxu0 %v1492_v39  ;;  %v246_v30 = vand.u32 4294901760, %v245_v22  ;;  %v265_v35 = vand.u32 4294901760, %v264_v26  ;;  %v197_v36 = vand.u32 4294901760, %v196_v18  ;;  %v271_v48 = vsub.f32 %v1495_v41, %v121_v52 }
  0x28   :  { %1163 = vmatprep.subr.bf16.mxu1 %v1492_v39  ;;  %v253_v32 = vand.u32 4294901760, %v252_v29  ;;  %v259_v43 = vsub.f32 %v257_v23, %v258_v34  ;;  %v278_v55 = vsub.f32 %v1499_v44, %v124_v57  ;;  %v1274_v2 = vpack.c.bf16 %v195_v63, %v188_v62 }
  0x29   :  { %v1566_v40 = vpack.c.bf16 %v265_v35, %v258_v34  ;;  %v266_v47 = vsub.f32 %v264_v26, %v265_v35  ;;  %v272_v1 = vand.u32 4294901760, %v271_v48  ;;  %v1178_v4 = vpack.c.bf16 %v197_v36, %v190_v28 }
  0x2a   :  { %1261 = vmatpush3.bf16.msra.mxu0 %v1492_v39  ;;  %v1569_v54 = vpack.c.bf16 %v253_v32, %v246_v30  ;;  %v260_v59 = vand.u32 4294901760, %v259_v43  ;;  %v279_v5 = vand.u32 4294901760, %v278_v55  ;;  %v285_v52 = vsub.f32 %v1523_v58, %v127_v7 }
  0x2b   :  { %1165 = vmatpush3.bf16.msra.mxu1 %v1492_v39  ;;  %1263 = vmatprep.subr.bf16.mxu0 %v1520_v56  ;;  %v267_v60 = vand.u32 4294901760, %v266_v47  ;;  %v273_v41 = vsub.f32 %v271_v48, %v272_v1  ;;  %v292_v44 = vsub.f32 %v83_v61, %v130_v10  ;;  %v1591_v10 = vpack.c.bf16 %v1503_v46, %v1501_v45 }
  0x2c   :  { %1167 = vmatprep.subr.bf16.mxu1 %v1520_v56  ;;  %v1579_v57 = vpack.c.bf16 %v279_v5, %v272_v1  ;;  %v280_v12 = vsub.f32 %v278_v55, %v279_v5  ;;  %v286_v17 = vand.u32 4294901760, %v285_v52  ;;  %v1595_v30 = vpack.c.bf16 %v1467_v25, %v1465_v24 }
  0x2d   :  { %v1576_v11 = vpack.c.bf16 %v267_v60, %v260_v59  ;;  %v274_v15 = vand.u32 4294901760, %v273_v41  ;;  %v293_v18 = vand.u32 4294901760, %v292_v44  ;;  %v1599_v34 = vpack.c.bf16 %v1488_v38, %v1486_v37 }
  0x2e   :  { %1265 = vmatpush3.bf16.msra.mxu0 %v1520_v56  ;;  %v281_v62 = vand.u32 4294901760, %v280_v12  ;;  %v287_v20 = vsub.f32 %v285_v52, %v286_v17  ;;  %v1603_v35 = vpack.c.bf16 %v1511_v51, %v1509_v50  ;;  %v1607_v28 = vpack.c.bf16 %v1540_v9, %v1535_v6 }
  0x2f   :  { %1169 = vmatpush3.bf16.msra.mxu1 %v1520_v56  ;;  %1267 = vmatprep.subr.bf16.mxu0 %v1547_v16  ;;  %v1583_v63 = vpack.c.bf16 %v293_v18, %v286_v17  ;;  %v294_v22 = vsub.f32 %v292_v44, %v293_v18  ;;  %v1609_v36 = vpack.c.bf16 %v264_v26, %v257_v23  ;;  %v54_v24 = vlaneseq }
  0x30   :  { %1171 = vmatprep.subr.bf16.mxu1 %v1547_v16  ;;  %v1585_v29 = vpack.c.bf16 %v281_v62, %v274_v15  ;;  %v288_v58 = vand.u32 4294901760, %v287_v20  ;;  %v1611_v45 = vpack.c.bf16 %v278_v55, %v271_v48  ;;  %v1613_v46 = vpack.c.bf16 %v292_v44, %v285_v52 }
  0x31   :  { %v295_v61 = vand.u32 4294901760, %v294_v22  ;;  %v55_v25 = vand.u32 127, %v54_v24  ;;  %v1408_v38 = vmov 0.0  }
  0x32   :  { %1269 = vmatpush3.bf16.msra.mxu0 %v1547_v16 }
  0x33   :  { %1173 = vmatpush3.bf16.msra.mxu1 %v1547_v16  ;;  %1271 = vmatprep.subr.bf16.mxu0 %v1564_v42  ;;  %v1587_v7 = vpack.c.bf16 %v295_v61, %v288_v58 }
  0x34   :  { %1175 = vmatprep.subr.bf16.mxu1 %v1564_v42 }
  0x36   :  { %1273 = vmatpush3.bf16.msra.mxu0 %v1564_v42 }
  0x37   :  { %1177 = vmatpush3.bf16.msra.mxu1 %v1564_v42  ;;  %1275 = vmatprep.subr.bf16.mxu0 %v1274_v2 }
  0x38   :  { %1179 = vmatprep.subr.bf16.mxu1 %v1178_v4 }
  0x94   :  { %v58_v32 = vpop.permute.xlu0 %57 }
  0x95   :  { %vm1615_vm0 = vcmp.eq.s32.totalorder %v58_v32, %v55_v25 }
  0x96   :  { %v820_v50 = vsel %vm1615_vm0, 1.0, %v1408_v38  ;;  %v64_v26 = vsel %vm1615_vm0, 1, %v1407_v0 }
  0x97   :  { %v1621_v51 = vsub.f32 %v820_v50, %v820_v50 }
  0x98   :  { %v61_v6 = vpop.permute.xlu0 %60 }
  0x99   :  { %vm1623_vm1 = vcmp.eq.s32.totalorder %v61_v6, %v55_v25  ;;  %v167_v23 = vand.u32 4294901760, %v1621_v51 }
  0x9a   :  { %v65_v43 = vsel %vm1623_vm1, 1, %v1407_v0  ;;  %v821_v47 = vsel %vm1623_vm1, 1.0, %v1408_v38  ;;  %v1409_v0 = vmov 1.0  }
  0x9b   :  { %v1636_v48 = vsub.f32 %v821_v47, %v821_v47  ;;  %v770_v55 = vadd.s32 %v65_v43, %v64_v26  ;;  %1073 = vmatprep.mubr.f32.mxu0 %v167_v23  ;;  %v168_v59 = vsub.f32 %v1621_v51, %v167_v23 }
  0x9d   :  { %v771_v60 = vrot.slane %v770_v55, 4  ;;  %v169_v1 = vand.u32 4294901760, %v168_v59  ;;  %v177_v5 = vand.u32 4294901760, %v1636_v48 }
  0x9f   :  { %v772_v41 = vadd.s32 %v771_v60, %v770_v55  ;;  %968 = vmatprep.mubr.f32.mxu1 %v169_v1  ;;  %1074 = vmatmul.mubr.f32.vlgmr.msra.gmra.mrb[0].mxu0 %v177_v5  ;;  %v178_v52 = vsub.f32 %v1636_v48, %v177_v5 }
  0xa0   :  { %1277 = vmatpush3.bf16.msra.mxu0 %v1274_v2  ;;  %1108 = vmatprep.mubr.msk.f32.mxu0 %vm1615_vm0, %v1409_v0 }
  0xa1   :  { %v773_v44 = vrot.slane %v772_v41, 2  ;;  %1279 = vmatprep.subr.bf16.mxu0 %v1481_v33  ;;  %v179_v12 = vand.u32 4294901760, %v178_v52 }
  0xa3   :  { %v774_v15 = vadd.s32 %v773_v44, %v772_v41  ;;  %969 = vmatmul.mubr.f32.vlgmr.msra.gmra.mrb[0].mxu1 %v179_v12 }
  0xa4   :  { %1181 = vmatpush3.bf16.msra.mxu1 %v1178_v4  ;;  %1281 = vmatpush3.bf16.msra.mxu0 %v1481_v33 }
  0xa5   :  { %v775_v17 = vrot.slane %v774_v15, 1  ;;  %1003 = vmatprep.mubr.msk.f32.mxu1 %vm1615_vm0, %v1409_v0  ;;  %1183 = vmatprep.subr.bf16.mxu1 %v1507_v49 }
  0xa6   :  { %1283 = vmatprep.subr.bf16.mxu0 %v1514_v53 }
  0xa7   :  { %v776_v2 = vadd.s32 %v775_v17, %v774_v15 }
  0xa8   :  { %1185 = vmatpush3.bf16.msra.mxu1 %v1507_v49  ;;  %1285 = vmatpush3.bf16.msra.mxu0 %v1514_v53 }
  0xa9   :  { %781 = vst [vmem:[%s1742_s3] sm:$0x1] %v776_v2  ;;  %1187 = vmatprep.subr.bf16.mxu1 %v1538_v8  ;;  %1287 = vmatprep.subr.bf16.mxu0 %v1531_v3  ;;  %s1410_s3 = smov [#allocation5]  }
  0xaa   :  { %s798_s30 = sshll.u32 %s1410_s3, 4  ;;  %s799_s30 = int_to_ptr.vmem [resolvable:$true] %s798_s30 }
  0xab   :  { %s1378_s4 = scalar_lea.vmem %s799_s30, 256  ;;  %p1383_p9 = scmp.lt.s32.totalorder %s799_s30, %s799_s30 }
  0xac   :  { %1189 = vmatpush3.bf16.msra.mxu1 %v1538_v8  ;;  %1289 = vmatpush3.bf16.msra.mxu0 %v1531_v3  ;;  %p1379_p8 = scmp.ne.s32.totalorder %s799_s30, %s1378_s4  ;;  %p1384_p10 = scmp.lt.s32.totalorder %s1378_s4, %s1378_s4 }
  0xad   :  { %1191 = vmatprep.subr.bf16.mxu1 %v1552_v21  ;;  %1291 = vmatprep.subr.bf16.mxu0 %v1557_v27 }
  0xae   :  { %p1385_p11 = por %p1384_p10, %p1383_p9 }
  0xb0   :  { %1193 = vmatpush3.bf16.msra.mxu1 %v1552_v21  ;;  %1293 = vmatpush3.bf16.msra.mxu0 %v1557_v27  ;;  %p1386_p12 = pnand %p1385_p11, %p1379_p8 }
  0xb1   :  { %1195 = vmatprep.subr.bf16.mxu1 %v1569_v54  ;;  %1295 = vmatprep.subr.bf16.mxu0 %v1566_v40 }
  0xb4   :  { %1197 = vmatpush3.bf16.msra.mxu1 %v1569_v54  ;;  %1297 = vmatpush3.bf16.msra.mxu0 %v1566_v40 }
  0xb5   :  { %1199 = vmatprep.subr.bf16.mxu1 %v1576_v11  ;;  %1299 = vmatprep.subr.bf16.mxu0 %v1579_v57 }
  0xb8   :  { %1201 = vmatpush3.bf16.msra.mxu1 %v1576_v11  ;;  %1301 = vmatpush3.bf16.msra.mxu0 %v1579_v57 }
  0xb9   :  { %1203 = vmatprep.subr.bf16.mxu1 %v1585_v29  ;;  %1303 = vmatprep.subr.bf16.mxu0 %v1583_v63 }
  0xbc   :  { %1205 = vmatpush3.bf16.msra.mxu1 %v1585_v29  ;;  %1305 = vmatpush3.bf16.msra.mxu0 %v1583_v63 }
  0xbd   :  { %1207 = vmatprep.subr.bf16.mxu1 %v1587_v7  ;;  %1307 = vmatprep.subr.bf16.mxu0 %v1453_v13 }
  0xbf   :  { %1109 = vmatmul.mubr.msk.f32.vlgmr.msra.gmra.mrb[0].mxu0 %vm1623_vm1, %v1409_v0 }
  0xc0   :  { %1209 = vmatpush3.bf16.msra.mxu1 %v1587_v7  ;;  %1309 = vmatpush3.bf16.msra.mxu0 %v1453_v13 }
  0xc1   :  { %1143 = vmatprep.mubr.msk.f32.mxu0 %vm1615_vm0, %v1409_v0  ;;  %1211 = vmatprep.subr.bf16.mxu1 %v1591_v10 }
  0xc2   :  { %1311 = vmatprep.subr.bf16.mxu0 %v1455_v14 }
  0xc3   :  { %1004 = vmatmul.mubr.msk.f32.vlgmr.msra.gmra.mrb[0].mxu1 %vm1623_vm1, %v1409_v0 }
  0xc4   :  { %1213 = vmatpush3.bf16.msra.mxu1 %v1591_v10  ;;  %1038 = vmatprep.mubr.f32.mxu1 %v1621_v51 }
  0xc5   :  { %1313 = vmatpush3.bf16.msra.mxu0 %v1455_v14  ;;  %1215 = vmatprep.subr.bf16.mxu1 %v1595_v30 }
  0xc6   :  { %1315 = vmatprep.subr.bf16.mxu0 %v1463_v19 }
  0xc8   :  { %1217 = vmatpush3.bf16.msra.mxu1 %v1595_v30 }
  0xc9   :  { %1317 = vmatpush3.bf16.msra.mxu0 %v1463_v19  ;;  %1219 = vmatprep.subr.bf16.mxu1 %v1599_v34 }
  0xca   :  { %1319 = vmatprep.subr.bf16.mxu0 %v1477_v31 }
  0xcc   :  { %1221 = vmatpush3.bf16.msra.mxu1 %v1599_v34 }
  0xcd   :  { %1321 = vmatpush3.bf16.msra.mxu0 %v1477_v31  ;;  %1223 = vmatprep.subr.bf16.mxu1 %v1603_v35 }
  0xce   :  { %1323 = vmatprep.subr.bf16.mxu0 %v1492_v39 }
  0xd0   :  { %1225 = vmatpush3.bf16.msra.mxu1 %v1603_v35 }
  0xd1   :  { %1325 = vmatpush3.bf16.msra.mxu0 %v1492_v39  ;;  %1227 = vmatprep.subr.bf16.mxu1 %v1607_v28 }
  0xd2   :  { %1327 = vmatprep.subr.bf16.mxu0 %v1520_v56 }
  0xd4   :  { %1229 = vmatpush3.bf16.msra.mxu1 %v1607_v28 }
  0xd5   :  { %1329 = vmatpush3.bf16.msra.mxu0 %v1520_v56  ;;  %1231 = vmatprep.subr.bf16.mxu1 %v1609_v36 }
  0xd6   :  { %1331 = vmatprep.subr.bf16.mxu0 %v1547_v16 }
  0xd8   :  { %1233 = vmatpush3.bf16.msra.mxu1 %v1609_v36 }
  0xd9   :  { %1333 = vmatpush3.bf16.msra.mxu0 %v1547_v16  ;;  %1235 = vmatprep.subr.bf16.mxu1 %v1611_v45 }
  0xda   :  { %1335 = vmatprep.subr.bf16.mxu0 %v1564_v42 }
  0xdc   :  { %1237 = vmatpush3.bf16.msra.mxu1 %v1611_v45 }
  0xdd   :  { %1337 = vmatpush3.bf16.msra.mxu0 %v1564_v42  ;;  %1239 = vmatprep.subr.bf16.mxu1 %v1613_v46 }
  0xe0   :  { %1144 = vmatmul.mubr.msk.f32.vlgmr.msra.gmra.mrb[0].mxu0 %vm1623_vm1, %v1409_v0  ;;  %1241 = vmatpush3.bf16.msra.mxu1 %v1613_v46 }
  0xe3   :  { %1039 = vmatmul.mubr.f32.vlgmr.msra.gmra.mrb[0].mxu1 %v1636_v48 }
 0x1b3   :  { %v1145_v13 = vpop.f32.mrb[0].mxu0 }
 0x1b4   :  { %v758_v14 = vpop.f32.mrb[1].mxu0 }
 0x1b6   :  { %v1040_v19 = vpop.f32.mrb[0].mxu1 }
 0x1b7   :  { %v1338_v31 = vadd.f32 %v1145_v13, %v1040_v19  ;;  %v442_v33 = vpop.f32.mrb[1].mxu1 }
 0x1b8   :  { %v1339_v39 = vadd.f32 %v758_v14, %v442_v33 }
 0x1b9   :  { %769 = vst [vmem:[#allocation5 + $0x8] sm:$0xff] %v1338_v31 }
 0x1ba   :  { %768 = vst [vmem:[#allocation5] sm:$0xff] %v1339_v39 }
 0x1bb   :  { %1389 = shalt.err (!%p1386_p12)
}
 0x1bc   :  { %s1390_s7 = scalar_lea.hbm %s1741_s2, 256 }
 0x1bd   :  { %p1391_p13 = scmp.ne.s32.totalorder %s1741_s2, %s1390_s7  ;;  %p1394_p0 = scmp.lt.u32.totalorder %s1390_s7, %s1741_s2 }
 0x1bf   :  { %p1396_p1 = pnand %p1394_p0, %p1391_p13 }
 0x1c1   :  { %1399 = shalt.err (!%p1396_p1)
}
 0x1c2   :  { %804 = dma.vmem_to_hbm [thread:$0]  %s799_s30, 256, %s1741_s2, [#allocation4], %s1405_s22, %s1405_s22, %s1406_s23  }
 0x1c3   :  { %1402 = dma.done.wait [#allocation4], 256  }
 0x1c4   :  { %1403 = vsyncadd [#allocation4], 4294967040 }
 0x1c5   :  { %812 = vsyncpa [#allocation3], 1 }
 0x1c6   :  { %813 = vsyncpa [#allocation4], 1 }

</bundles_post_ra>
